<compile_context>
chip_gen: v6e
topology: v6e:2x2x1
jax: 0.10.0
libtpu: 0.0.40
codegen_flags: <defaults>
</compile_context>

<pallas_src>
import functools

import jax
import jax.numpy as jnp
from jax.experimental import pallas as pl
from jax.experimental.pallas import tpu as pltpu


# ----------------------------------------------------------------------------
# Fused Pallas kernel:
#   grid step 0  : num_layers x (GATConv -> ELU -> L2 normalize) -> Linear+ReLU (h1)
#   every step j : logits[:, j*TN:(j+1)*TN] = h1 @ pred_w2_block + pred_b2_block
# ----------------------------------------------------------------------------
def _fused_gnn_kernel(*refs, num_layers, num_heads, out_channels):
    H, C = num_heads, out_channels
    HC = H * C

    n_in = 2 + 2 * num_layers + 4
    x0_ref, mask_ref = refs[0], refs[1]
    layer_refs = refs[2:2 + 2 * num_layers]        # (fused W|WA, bias) per layer
    pw1_ref, pb1_ref, pw2_ref, pb2_ref = refs[2 + 2 * num_layers:n_in]
    out_ref = refs[n_in]                           # [1, TN] logits column block
    h1_ref = refs[n_in + 1]                        # VMEM scratch [1, hidden] (carried)

    @pl.when(pl.program_id(0) == 0)
    def _compute_graph():
        mask = mask_ref[...].astype(jnp.float32)   # bf16 in VMEM, upcast once
        x = x0_ref[...]                            # [N, F0] f32
        N = x.shape[0]
        ones_col = jnp.ones((N, 1), jnp.bfloat16)

        for l in range(num_layers):                # static unroll, num_layers is small
            wa_ref, b_ref = layer_refs[2 * l], layer_refs[2 * l + 1]

            # One MXU pass produces projection AND all per-head attention coeffs:
            #   cols [0, HC)        -> xw
            #   cols [HC, HC+H)     -> <xw_h, att_src_h>
            #   cols [HC+H, HC+2H)  -> <xw_h, att_dst_h>
            xw_alpha = jnp.dot(x.astype(jnp.bfloat16), wa_ref[...],
                               preferred_element_type=jnp.float32)      # [N, HC+2H]
            xw_bf = xw_alpha[:, :HC].astype(jnp.bfloat16)
            alpha_src_t = jnp.transpose(xw_alpha[:, HC:HC + H])         # [H, N]
            alpha_dst = xw_alpha[:, HC + H:HC + 2 * H]                  # [N, H]

            head_outs = []
            for h in range(H):                                          # static unroll
                # e[dst, src] = LeakyReLU(a_dst[dst] + a_src[src], 0.2) + additive mask
                e = alpha_dst[:, h:h + 1] + alpha_src_t[h:h + 1, :]     # [N, N]
                e = jnp.maximum(e, 0.2 * e)
                e = e + mask

                # Softmax over incoming edges (src axis); masked entries underflow to
                # exactly 0 after exp (self-loops guarantee a finite row max).
                e_max = jnp.max(e, axis=1, keepdims=True)
                p = jnp.exp(e - e_max).astype(jnp.bfloat16)             # [N, N]

                # Fold row_sum into the aggregation matmul: [xw_h | 1] RHS.
                rhs = jnp.concatenate([xw_bf[:, h * C:(h + 1) * C], ones_col], axis=1)
                agg_plus = jnp.dot(p, rhs, preferred_element_type=jnp.float32)  # [N, C+1]
                row_sum = agg_plus[:, C:C + 1]                          # [N, 1]
                head_outs.append(agg_plus[:, :C] *
                                 pl.reciprocal(row_sum, approx=True))

            out_l = jnp.concatenate(head_outs, axis=1) + b_ref[...]     # [N, HC]
            # F.elu (alpha=1)
            out_l = jnp.where(out_l > 0, out_l,
                              jnp.exp(jnp.minimum(out_l, 0.0)) - 1.0)
            # F.normalize(p=2, dim=-1, eps=1e-12)
            nrm = jnp.sqrt(jnp.sum(out_l * out_l, axis=-1, keepdims=True))
            x = out_l / jnp.maximum(nrm, 1e-12)

        # context = x[-1].unsqueeze(0); predictor first Linear + ReLU (Dropout = id)
        ctx = x[N - 1:N, :]                                             # [1, HC]
        h1 = jnp.dot(ctx.astype(jnp.bfloat16), pw1_ref[...],
                     preferred_element_type=jnp.float32) + pb1_ref[...]
        h1_ref[...] = jnp.maximum(h1, 0.0)

    # Every grid step: one 128-lane column block of the final Linear.
    logits = jnp.dot(h1_ref[...].astype(jnp.bfloat16), pw2_ref[...],
                     preferred_element_type=jnp.float32) + pb2_ref[...]
    out_ref[...] = logits.astype(out_ref.dtype)


# ----------------------------------------------------------------------------
# Wrapper: single fused pallas_call, grid over predictor output column blocks.
# ----------------------------------------------------------------------------
def _vmem_cap_bytes():
    try:
        return int(pltpu.get_tpu_info().vmem_capacity_bytes)
    except Exception:
        return 64 * 1024 * 1024


def fused_gnn_forward(x0, mask, layer_args, pred_args, *, num_heads, out_channels,
                      num_layers, tn=128):
    pw1, pb1, pw2, pb2 = pred_args
    hidden = pw1.shape[1]
    num_items_padded = pw2.shape[1]
    assert num_items_padded % tn == 0
    n_blocks = num_items_padded // tn

    args = [x0, mask]
    specs = [pl.BlockSpec(x0.shape, lambda j: (0, 0)),
             pl.BlockSpec(mask.shape, lambda j: (0, 0))]
    for (wa, b) in layer_args:
        args += [wa, b]
        specs += [pl.BlockSpec(wa.shape, lambda j: (0, 0)),
                  pl.BlockSpec(b.shape, lambda j: (0, 0))]
    args += [pw1, pb1, pw2, pb2]
    specs += [pl.BlockSpec(pw1.shape, lambda j: (0, 0)),
              pl.BlockSpec(pb1.shape, lambda j: (0, 0)),
              pl.BlockSpec((hidden, tn), lambda j: (0, j)),   # streamed column block
              pl.BlockSpec((1, tn), lambda j: (0, j))]        # streamed bias block
    out_spec = pl.BlockSpec((1, tn), lambda j: (0, j))        # lane-dense output block

    # Exact-ish VMEM accounting: resident inputs once, streamed blocks double-buffered,
    # h1 scratch (one padded (8,128) f32 tile) + compiler slack; capped per generation.
    resident = sum(int(a.size) * a.dtype.itemsize for a in args[:-2])
    streamed = 2 * (hidden * tn * pw2.dtype.itemsize
                    + tn * pb2.dtype.itemsize + tn * 4)
    scratch_bytes = 8 * 128 * 4
    needed = resident + streamed + scratch_bytes + (16 << 20)
    cap = _vmem_cap_bytes()
    vmem_limit = int(min(needed, max(cap - (4 << 20), 16 << 20)))

    kernel = functools.partial(_fused_gnn_kernel, num_layers=num_layers,
                               num_heads=num_heads, out_channels=out_channels)
    return pl.pallas_call(
        kernel,
        grid=(n_blocks,),
        out_shape=jax.ShapeDtypeStruct((1, num_items_padded), jnp.float32),
        in_specs=specs,
        out_specs=out_spec,
        scratch_shapes=[pltpu.VMEM((1, hidden), jnp.float32)],
        compiler_params=pltpu.CompilerParams(
            dimension_semantics=("arbitrary",),   # h1 scratch carried across steps
            vmem_limit_bytes=vmem_limit),
    )(*args)


# ----------------------------------------------------------------------------
# Model glue (parameter init, embedding gather, mask / fused-weight construction)
# ----------------------------------------------------------------------------
def init_params(key, num_items, hidden_dim, num_heads, num_layers):
    n_keys = 1 + 3 * num_layers + 2
    keys = jax.random.split(key, n_keys)
    ki = iter(range(n_keys))

    params = {
        "embedding": 0.1 * jax.random.normal(keys[next(ki)],
                                             (num_items, hidden_dim), jnp.float32)
    }
    layers = []
    for i in range(num_layers):
        in_ch = hidden_dim * num_heads if i > 0 else hidden_dim
        scale = 1.0 / jnp.sqrt(jnp.float32(in_ch))
        layers.append({
            "w": scale * jax.random.normal(keys[next(ki)],
                                           (in_ch, num_heads * hidden_dim), jnp.float32),
            "att_src": 0.1 * jax.random.normal(keys[next(ki)],
                                               (num_heads, hidden_dim), jnp.float32),
            "att_dst": 0.1 * jax.random.normal(keys[next(ki)],
                                               (num_heads, hidden_dim), jnp.float32),
            "bias": jnp.zeros((1, num_heads * hidden_dim), jnp.float32),
        })
    params["gat_layers"] = layers

    hc = hidden_dim * num_heads
    params["pred_w1"] = (1.0 / jnp.sqrt(jnp.float32(hc))) * jax.random.normal(
        keys[next(ki)], (hc, hidden_dim), jnp.float32)
    params["pred_b1"] = jnp.zeros((1, hidden_dim), jnp.float32)
    params["pred_w2"] = (1.0 / jnp.sqrt(jnp.float32(hidden_dim))) * jax.random.normal(
        keys[next(ki)], (hidden_dim, num_items), jnp.float32)
    params["pred_b2"] = jnp.zeros((1, num_items), jnp.float32)
    return params


def build_additive_mask(edge_index, num_nodes):
    """mask[dst, src] = 0 for every edge src->dst (plus self loops), -1e30 elsewhere.
    Stored bf16 (exponent range matches f32); upcast happens in-kernel."""
    src, dst = edge_index[0], edge_index[1]
    adj = jnp.zeros((num_nodes, num_nodes), jnp.float32)
    adj = adj.at[dst, src].set(1.0)
    idx = jnp.arange(num_nodes)
    adj = adj.at[idx, idx].set(1.0)      # add_self_loops=True -> every row has a live entry
    return jnp.where(adj > 0, 0.0, -1e30).astype(jnp.bfloat16)


def build_att_matrix(att_src, att_dst):
    """Block-diagonal [H*C, 2H]: col h holds att_src[h] in rows h*C:(h+1)*C,
    col H+h holds att_dst[h]."""
    H, C = att_src.shape
    A = jnp.zeros((H * C, 2 * H), jnp.float32)
    for h in range(H):
        A = A.at[h * C:(h + 1) * C, h].set(att_src[h])
        A = A.at[h * C:(h + 1) * C, H + h].set(att_dst[h])
    return A


def fuse_layer_weights(w, att_src, att_dst):
    """[W | W @ A] so one MXU pass yields both xw and all per-head attention coeffs."""
    A = build_att_matrix(att_src, att_dst)
    wa = jnp.concatenate([w, w @ A], axis=1)        # [in_ch, H*C + 2H]
    return wa.astype(jnp.bfloat16)


def transaction_gnn_forward(params, y, edge_index, *, hidden_dim, num_heads):
    num_nodes = y.shape[0]
    num_layers = len(params["gat_layers"])
    num_items = params["pred_w2"].shape[1]
    # TODO(synk): the x.size(0) == 0 early-return branch is a host-side shape check;
    # not representable in a fixed-shape kernel, we assume num_nodes > 0.
    x0 = jnp.take(params["embedding"], y, axis=0)          # embedding lookup (glue)
    mask = build_additive_mask(edge_index, num_nodes)

    layer_args = []
    for layer in params["gat_layers"]:
        # F.dropout(...) is identity in eval mode.
        layer_args.append((fuse_layer_weights(layer["w"], layer["att_src"],
                                              layer["att_dst"]),
                           layer["bias"]))

    # Pad the item axis to a multiple of 128 lanes (lane-dense output stores),
    # pre-cast predictor weights to bf16; slice the padding off on the host.
    tn = 128
    num_items_padded = ((num_items + tn - 1) // tn) * tn
    pad = num_items_padded - num_items
    pred_args = (params["pred_w1"].astype(jnp.bfloat16),
                 params["pred_b1"],
                 jnp.pad(params["pred_w2"], ((0, 0), (0, pad))).astype(jnp.bfloat16),
                 jnp.pad(params["pred_b2"], ((0, 0), (0, pad))))

    logits = fused_gnn_forward(x0, mask, layer_args, pred_args,
                               num_heads=num_heads, out_channels=hidden_dim,
                               num_layers=num_layers, tn=tn)
    return logits[0, :num_items]                            # squeeze(0) -> [num_items]


# ----------------------------------------------------------------------------
if __name__ == "__main__":
    num_items = 64
    hidden_dim = 32
    num_heads = 4
    num_layers = 2
    num_nodes = 8

    key = jax.random.PRNGKey(0)
    k_y, k_params = jax.random.split(key)

    # data.y : item index per node; data.edge_index : bidirectional chain graph
    y = jax.random.randint(k_y, (num_nodes,), 0, num_items, dtype=jnp.int32)
    fwd = jnp.arange(num_nodes - 1, dtype=jnp.int32)
    edge_index = jnp.stack([
        jnp.concatenate([fwd, fwd + 1]),   # src
        jnp.concatenate([fwd + 1, fwd]),   # dst
    ])                                      # [2, 2*(N-1)]

    params = init_params(k_params, num_items, hidden_dim, num_heads, num_layers)

    logits = transaction_gnn_forward(params, y, edge_index,
                                     hidden_dim=hidden_dim, num_heads=num_heads)
    logits = jax.block_until_ready(logits)

    assert logits.shape == (num_items,)
    assert logits.dtype == jnp.float32
    assert bool(jnp.all(jnp.isfinite(logits)))
    print("KERNEL_OK")
</pallas_src>

<mosaic_0001>
module attributes {stable_mosaic.version = 11 : i64} {
  func.func @_fused_gnn_kernel(%arg0: i32, %arg1: memref<8x32xf32, #tpu.memory_space<vmem>>, %arg2: memref<8x8xbf16, #tpu.memory_space<vmem>>, %arg3: memref<32x136xbf16, #tpu.memory_space<vmem>>, %arg4: memref<1x128xf32, #tpu.memory_space<vmem>>, %arg5: memref<128x136xbf16, #tpu.memory_space<vmem>>, %arg6: memref<1x128xf32, #tpu.memory_space<vmem>>, %arg7: memref<128x32xbf16, #tpu.memory_space<vmem>>, %arg8: memref<1x32xf32, #tpu.memory_space<vmem>>, %arg9: memref<32x128xbf16, #tpu.memory_space<vmem>>, %arg10: memref<1x128xf32, #tpu.memory_space<vmem>>, %arg11: memref<1x128xf32, #tpu.memory_space<vmem>>, %arg12: memref<1x32xf32, #tpu.memory_space<vmem>>) attributes {dimension_semantics = [#tpu.dimension_semantics<arbitrary>], iteration_bounds = array<i64: 1>, scalar_prefetch = 0 : i64, scratch_operands = 1 : i64, tpu.core_type = #tpu.core_type<tc>, window_params = [{pipeline_mode = #tpu.pipeline_mode<synchronous>, transform_indices = @transform_0, window_bounds = array<i64: 8, 32>}, {pipeline_mode = #tpu.pipeline_mode<synchronous>, transform_indices = @transform_1, window_bounds = array<i64: 8, 8>}, {pipeline_mode = #tpu.pipeline_mode<synchronous>, transform_indices = @transform_2, window_bounds = array<i64: 32, 136>}, {pipeline_mode = #tpu.pipeline_mode<synchronous>, transform_indices = @transform_3, window_bounds = array<i64: 1, 128>}, {pipeline_mode = #tpu.pipeline_mode<synchronous>, transform_indices = @transform_4, window_bounds = array<i64: 128, 136>}, {pipeline_mode = #tpu.pipeline_mode<synchronous>, transform_indices = @transform_5, window_bounds = array<i64: 1, 128>}, {pipeline_mode = #tpu.pipeline_mode<synchronous>, transform_indices = @transform_6, window_bounds = array<i64: 128, 32>}, {pipeline_mode = #tpu.pipeline_mode<synchronous>, transform_indices = @transform_7, window_bounds = array<i64: 1, 32>}, {transform_indices = @transform_8, window_bounds = array<i64: 32, 128>}, {transform_indices = @transform_9, window_bounds = array<i64: 1, 128>}, {transform_indices = @transform_10, window_bounds = array<i64: 1, 128>}]} {
    %c0_i32 = arith.constant 0 : i32
    %0 = arith.cmpi eq, %arg0, %c0_i32 : i32
    %1 = arith.extui %0 : i1 to i32
    %c0_i32_0 = arith.constant 0 : i32
    %2 = arith.cmpi ne, %1, %c0_i32_0 : i32
    scf.if %2 {
      %c0_8 = arith.constant 0 : index
      %c0_9 = arith.constant 0 : index
      %10 = vector.load %arg2[%c0_8, %c0_9] : memref<8x8xbf16, #tpu.memory_space<vmem>>, vector<8x8xbf16>
      %11 = arith.extf %10 : vector<8x8xbf16> to vector<8x8xf32>
      %c0_10 = arith.constant 0 : index
      %c0_11 = arith.constant 0 : index
      %12 = vector.load %arg1[%c0_10, %c0_11] : memref<8x32xf32, #tpu.memory_space<vmem>>, vector<8x32xf32>
      %cst_12 = arith.constant 1.000000e+00 : bf16
      %13 = vector.broadcast %cst_12 : bf16 to vector<8x1xbf16>
      %14 = arith.truncf %12 : vector<8x32xf32> to vector<8x32xbf16>
      %c0_13 = arith.constant 0 : index
      %c0_14 = arith.constant 0 : index
      %15 = vector.load %arg3[%c0_13, %c0_14] : memref<32x136xbf16, #tpu.memory_space<vmem>>, vector<32x136xbf16>
      %cst_15 = arith.constant dense<0.000000e+00> : vector<8x136xf32>
      %16 = tpu.matmul %14, %15, %cst_15 {dimension_numbers = #tpu.dot_dimension_numbers<[1], [0], [0], [1], [0, 0, 1, 1], [], []>} : vector<8x32xbf16>, vector<32x136xbf16>, vector<8x136xf32> -> vector<8x136xf32>
      %17 = vector.extract_strided_slice %16 {offsets = [0, 0], sizes = [8, 128], strides = [1, 1]} : vector<8x136xf32> to vector<8x128xf32>
      %18 = arith.truncf %17 : vector<8x128xf32> to vector<8x128xbf16>
      %19 = vector.extract_strided_slice %16 {offsets = [0, 128], sizes = [8, 4], strides = [1, 1]} : vector<8x136xf32> to vector<8x4xf32>
      %20 = tpu.transpose %19, [1, 0] : vector<8x4xf32> -> vector<4x8xf32>
      %21 = vector.extract_strided_slice %16 {offsets = [0, 132], sizes = [8, 4], strides = [1, 1]} : vector<8x136xf32> to vector<8x4xf32>
      %22 = vector.extract_strided_slice %21 {offsets = [0, 0], sizes = [8, 1], strides = [1, 1]} : vector<8x4xf32> to vector<8x1xf32>
      %23 = vector.extract_strided_slice %20 {offsets = [0, 0], sizes = [1, 8], strides = [1, 1]} : vector<4x8xf32> to vector<1x8xf32>
      %24 = vector.broadcast %22 : vector<8x1xf32> to vector<8x8xf32>
      %25 = vector.broadcast %23 : vector<1x8xf32> to vector<8x8xf32>
      %26 = arith.addf %24, %25 : vector<8x8xf32>
      %cst_16 = arith.constant 2.000000e-01 : f32
      %27 = vector.broadcast %cst_16 : f32 to vector<8x8xf32>
      %28 = arith.mulf %27, %26 : vector<8x8xf32>
      %29 = arith.maximumf %26, %28 : vector<8x8xf32>
      %30 = arith.addf %29, %11 : vector<8x8xf32>
      %cst_17 = arith.constant dense<0xFF800000> : vector<8xf32>
      %31 = vector.multi_reduction <maximumf>, %30, %cst_17 [1] : vector<8x8xf32> to vector<8xf32>
      %32 = vector.shape_cast %31 : vector<8xf32> to vector<8x1xf32>
      %33 = vector.broadcast %32 : vector<8x1xf32> to vector<8x8xf32>
      %34 = arith.subf %30, %33 : vector<8x8xf32>
      %35 = math.exp %34 : vector<8x8xf32>
      %36 = arith.truncf %35 : vector<8x8xf32> to vector<8x8xbf16>
      %37 = vector.extract_strided_slice %18 {offsets = [0, 0], sizes = [8, 32], strides = [1, 1]} : vector<8x128xbf16> to vector<8x32xbf16>
      %38 = tpu.concatenate %37, %13 in 1 : vector<8x32xbf16>, vector<8x1xbf16> -> vector<8x33xbf16>
      %cst_18 = arith.constant dense<0.000000e+00> : vector<8x33xf32>
      %39 = tpu.matmul %36, %38, %cst_18 {dimension_numbers = #tpu.dot_dimension_numbers<[1], [0], [0], [1], [0, 0, 1, 1], [], []>} : vector<8x8xbf16>, vector<8x33xbf16>, vector<8x33xf32> -> vector<8x33xf32>
      %40 = vector.extract_strided_slice %39 {offsets = [0, 32], sizes = [8, 1], strides = [1, 1]} : vector<8x33xf32> to vector<8x1xf32>
      %41 = vector.extract_strided_slice %39 {offsets = [0, 0], sizes = [8, 32], strides = [1, 1]} : vector<8x33xf32> to vector<8x32xf32>
      %42 = tpu.reciprocal %40 {approx = true} : vector<8x1xf32> -> vector<8x1xf32>
      %43 = vector.broadcast %42 : vector<8x1xf32> to vector<8x32xf32>
      %44 = arith.mulf %41, %43 : vector<8x32xf32>
      %45 = vector.extract_strided_slice %21 {offsets = [0, 1], sizes = [8, 1], strides = [1, 1]} : vector<8x4xf32> to vector<8x1xf32>
      %46 = vector.extract_strided_slice %20 {offsets = [1, 0], sizes = [1, 8], strides = [1, 1]} : vector<4x8xf32> to vector<1x8xf32>
      %47 = vector.broadcast %45 : vector<8x1xf32> to vector<8x8xf32>
      %48 = vector.broadcast %46 : vector<1x8xf32> to vector<8x8xf32>
      %49 = arith.addf %47, %48 : vector<8x8xf32>
      %cst_19 = arith.constant 2.000000e-01 : f32
      %50 = vector.broadcast %cst_19 : f32 to vector<8x8xf32>
      %51 = arith.mulf %50, %49 : vector<8x8xf32>
      %52 = arith.maximumf %49, %51 : vector<8x8xf32>
      %53 = arith.addf %52, %11 : vector<8x8xf32>
      %cst_20 = arith.constant dense<0xFF800000> : vector<8xf32>
      %54 = vector.multi_reduction <maximumf>, %53, %cst_20 [1] : vector<8x8xf32> to vector<8xf32>
      %55 = vector.shape_cast %54 : vector<8xf32> to vector<8x1xf32>
      %56 = vector.broadcast %55 : vector<8x1xf32> to vector<8x8xf32>
      %57 = arith.subf %53, %56 : vector<8x8xf32>
      %58 = math.exp %57 : vector<8x8xf32>
      %59 = arith.truncf %58 : vector<8x8xf32> to vector<8x8xbf16>
      %60 = vector.extract_strided_slice %18 {offsets = [0, 32], sizes = [8, 32], strides = [1, 1]} : vector<8x128xbf16> to vector<8x32xbf16>
      %61 = tpu.concatenate %60, %13 in 1 : vector<8x32xbf16>, vector<8x1xbf16> -> vector<8x33xbf16>
      %cst_21 = arith.constant dense<0.000000e+00> : vector<8x33xf32>
      %62 = tpu.matmul %59, %61, %cst_21 {dimension_numbers = #tpu.dot_dimension_numbers<[1], [0], [0], [1], [0, 0, 1, 1], [], []>} : vector<8x8xbf16>, vector<8x33xbf16>, vector<8x33xf32> -> vector<8x33xf32>
      %63 = vector.extract_strided_slice %62 {offsets = [0, 32], sizes = [8, 1], strides = [1, 1]} : vector<8x33xf32> to vector<8x1xf32>
      %64 = vector.extract_strided_slice %62 {offsets = [0, 0], sizes = [8, 32], strides = [1, 1]} : vector<8x33xf32> to vector<8x32xf32>
      %65 = tpu.reciprocal %63 {approx = true} : vector<8x1xf32> -> vector<8x1xf32>
      %66 = vector.broadcast %65 : vector<8x1xf32> to vector<8x32xf32>
      %67 = arith.mulf %64, %66 : vector<8x32xf32>
      %68 = vector.extract_strided_slice %21 {offsets = [0, 2], sizes = [8, 1], strides = [1, 1]} : vector<8x4xf32> to vector<8x1xf32>
      %69 = vector.extract_strided_slice %20 {offsets = [2, 0], sizes = [1, 8], strides = [1, 1]} : vector<4x8xf32> to vector<1x8xf32>
      %70 = vector.broadcast %68 : vector<8x1xf32> to vector<8x8xf32>
      %71 = vector.broadcast %69 : vector<1x8xf32> to vector<8x8xf32>
      %72 = arith.addf %70, %71 : vector<8x8xf32>
      %cst_22 = arith.constant 2.000000e-01 : f32
      %73 = vector.broadcast %cst_22 : f32 to vector<8x8xf32>
      %74 = arith.mulf %73, %72 : vector<8x8xf32>
      %75 = arith.maximumf %72, %74 : vector<8x8xf32>
      %76 = arith.addf %75, %11 : vector<8x8xf32>
      %cst_23 = arith.constant dense<0xFF800000> : vector<8xf32>
      %77 = vector.multi_reduction <maximumf>, %76, %cst_23 [1] : vector<8x8xf32> to vector<8xf32>
      %78 = vector.shape_cast %77 : vector<8xf32> to vector<8x1xf32>
      %79 = vector.broadcast %78 : vector<8x1xf32> to vector<8x8xf32>
      %80 = arith.subf %76, %79 : vector<8x8xf32>
      %81 = math.exp %80 : vector<8x8xf32>
      %82 = arith.truncf %81 : vector<8x8xf32> to vector<8x8xbf16>
      %83 = vector.extract_strided_slice %18 {offsets = [0, 64], sizes = [8, 32], strides = [1, 1]} : vector<8x128xbf16> to vector<8x32xbf16>
      %84 = tpu.concatenate %83, %13 in 1 : vector<8x32xbf16>, vector<8x1xbf16> -> vector<8x33xbf16>
      %cst_24 = arith.constant dense<0.000000e+00> : vector<8x33xf32>
      %85 = tpu.matmul %82, %84, %cst_24 {dimension_numbers = #tpu.dot_dimension_numbers<[1], [0], [0], [1], [0, 0, 1, 1], [], []>} : vector<8x8xbf16>, vector<8x33xbf16>, vector<8x33xf32> -> vector<8x33xf32>
      %86 = vector.extract_strided_slice %85 {offsets = [0, 32], sizes = [8, 1], strides = [1, 1]} : vector<8x33xf32> to vector<8x1xf32>
      %87 = vector.extract_strided_slice %85 {offsets = [0, 0], sizes = [8, 32], strides = [1, 1]} : vector<8x33xf32> to vector<8x32xf32>
      %88 = tpu.reciprocal %86 {approx = true} : vector<8x1xf32> -> vector<8x1xf32>
      %89 = vector.broadcast %88 : vector<8x1xf32> to vector<8x32xf32>
      %90 = arith.mulf %87, %89 : vector<8x32xf32>
      %91 = vector.extract_strided_slice %21 {offsets = [0, 3], sizes = [8, 1], strides = [1, 1]} : vector<8x4xf32> to vector<8x1xf32>
      %92 = vector.extract_strided_slice %20 {offsets = [3, 0], sizes = [1, 8], strides = [1, 1]} : vector<4x8xf32> to vector<1x8xf32>
      %93 = vector.broadcast %91 : vector<8x1xf32> to vector<8x8xf32>
      %94 = vector.broadcast %92 : vector<1x8xf32> to vector<8x8xf32>
      %95 = arith.addf %93, %94 : vector<8x8xf32>
      %cst_25 = arith.constant 2.000000e-01 : f32
      %96 = vector.broadcast %cst_25 : f32 to vector<8x8xf32>
      %97 = arith.mulf %96, %95 : vector<8x8xf32>
      %98 = arith.maximumf %95, %97 : vector<8x8xf32>
      %99 = arith.addf %98, %11 : vector<8x8xf32>
      %cst_26 = arith.constant dense<0xFF800000> : vector<8xf32>
      %100 = vector.multi_reduction <maximumf>, %99, %cst_26 [1] : vector<8x8xf32> to vector<8xf32>
      %101 = vector.shape_cast %100 : vector<8xf32> to vector<8x1xf32>
      %102 = vector.broadcast %101 : vector<8x1xf32> to vector<8x8xf32>
      %103 = arith.subf %99, %102 : vector<8x8xf32>
      %104 = math.exp %103 : vector<8x8xf32>
      %105 = arith.truncf %104 : vector<8x8xf32> to vector<8x8xbf16>
      %106 = vector.extract_strided_slice %18 {offsets = [0, 96], sizes = [8, 32], strides = [1, 1]} : vector<8x128xbf16> to vector<8x32xbf16>
      %107 = tpu.concatenate %106, %13 in 1 : vector<8x32xbf16>, vector<8x1xbf16> -> vector<8x33xbf16>
      %cst_27 = arith.constant dense<0.000000e+00> : vector<8x33xf32>
      %108 = tpu.matmul %105, %107, %cst_27 {dimension_numbers = #tpu.dot_dimension_numbers<[1], [0], [0], [1], [0, 0, 1, 1], [], []>} : vector<8x8xbf16>, vector<8x33xbf16>, vector<8x33xf32> -> vector<8x33xf32>
      %109 = vector.extract_strided_slice %108 {offsets = [0, 32], sizes = [8, 1], strides = [1, 1]} : vector<8x33xf32> to vector<8x1xf32>
      %110 = vector.extract_strided_slice %108 {offsets = [0, 0], sizes = [8, 32], strides = [1, 1]} : vector<8x33xf32> to vector<8x32xf32>
      %111 = tpu.reciprocal %109 {approx = true} : vector<8x1xf32> -> vector<8x1xf32>
      %112 = vector.broadcast %111 : vector<8x1xf32> to vector<8x32xf32>
      %113 = arith.mulf %110, %112 : vector<8x32xf32>
      %114 = tpu.concatenate %44, %67, %90, %113 in 1 : vector<8x32xf32>, vector<8x32xf32>, vector<8x32xf32>, vector<8x32xf32> -> vector<8x128xf32>
      %c0_28 = arith.constant 0 : index
      %c0_29 = arith.constant 0 : index
      %115 = vector.load %arg4[%c0_28, %c0_29] : memref<1x128xf32, #tpu.memory_space<vmem>>, vector<1x128xf32>
      %116 = vector.broadcast %115 : vector<1x128xf32> to vector<8x128xf32>
      %117 = arith.addf %114, %116 : vector<8x128xf32>
      %cst_30 = arith.constant 0.000000e+00 : f32
      %118 = vector.broadcast %cst_30 : f32 to vector<8x128xf32>
      %119 = arith.cmpf ogt, %117, %118 : vector<8x128xf32>
      %cst_31 = arith.constant 0.000000e+00 : f32
      %120 = vector.broadcast %cst_31 : f32 to vector<8x128xf32>
      %121 = arith.minimumf %117, %120 : vector<8x128xf32>
      %122 = math.exp %121 : vector<8x128xf32>
      %cst_32 = arith.constant 1.000000e+00 : f32
      %123 = vector.broadcast %cst_32 : f32 to vector<8x128xf32>
      %124 = arith.subf %122, %123 : vector<8x128xf32>
      %125 = arith.select %119, %117, %124 : vector<8x128xi1>, vector<8x128xf32>
      %126 = arith.mulf %125, %125 : vector<8x128xf32>
      %cst_33 = arith.constant dense<0.000000e+00> : vector<8xf32>
      %127 = vector.multi_reduction <add>, %126, %cst_33 [1] : vector<8x128xf32> to vector<8xf32>
      %128 = vector.shape_cast %127 : vector<8xf32> to vector<8x1xf32>
      %129 = math.sqrt %128 : vector<8x1xf32>
      %cst_34 = arith.constant 9.99999996E-13 : f32
      %130 = vector.broadcast %cst_34 : f32 to vector<8x1xf32>
      %131 = arith.maximumf %129, %130 : vector<8x1xf32>
      %132 = vector.broadcast %131 : vector<8x1xf32> to vector<8x128xf32>
      %133 = arith.divf %125, %132 : vector<8x128xf32>
      %134 = arith.truncf %133 : vector<8x128xf32> to vector<8x128xbf16>
      %c0_35 = arith.constant 0 : index
      %c0_36 = arith.constant 0 : index
      %135 = vector.load %arg5[%c0_35, %c0_36] : memref<128x136xbf16, #tpu.memory_space<vmem>>, vector<128x136xbf16>
      %cst_37 = arith.constant dense<0.000000e+00> : vector<8x136xf32>
      %136 = tpu.matmul %134, %135, %cst_37 {dimension_numbers = #tpu.dot_dimension_numbers<[1], [0], [0], [1], [0, 0, 1, 1], [], []>} : vector<8x128xbf16>, vector<128x136xbf16>, vector<8x136xf32> -> vector<8x136xf32>
      %137 = vector.extract_strided_slice %136 {offsets = [0, 0], sizes = [8, 128], strides = [1, 1]} : vector<8x136xf32> to vector<8x128xf32>
      %138 = arith.truncf %137 : vector<8x128xf32> to vector<8x128xbf16>
      %139 = vector.extract_strided_slice %136 {offsets = [0, 128], sizes = [8, 4], strides = [1, 1]} : vector<8x136xf32> to vector<8x4xf32>
      %140 = tpu.transpose %139, [1, 0] : vector<8x4xf32> -> vector<4x8xf32>
      %141 = vector.extract_strided_slice %136 {offsets = [0, 132], sizes = [8, 4], strides = [1, 1]} : vector<8x136xf32> to vector<8x4xf32>
      %142 = vector.extract_strided_slice %141 {offsets = [0, 0], sizes = [8, 1], strides = [1, 1]} : vector<8x4xf32> to vector<8x1xf32>
      %143 = vector.extract_strided_slice %140 {offsets = [0, 0], sizes = [1, 8], strides = [1, 1]} : vector<4x8xf32> to vector<1x8xf32>
      %144 = vector.broadcast %142 : vector<8x1xf32> to vector<8x8xf32>
      %145 = vector.broadcast %143 : vector<1x8xf32> to vector<8x8xf32>
      %146 = arith.addf %144, %145 : vector<8x8xf32>
      %cst_38 = arith.constant 2.000000e-01 : f32
      %147 = vector.broadcast %cst_38 : f32 to vector<8x8xf32>
      %148 = arith.mulf %147, %146 : vector<8x8xf32>
      %149 = arith.maximumf %146, %148 : vector<8x8xf32>
      %150 = arith.addf %149, %11 : vector<8x8xf32>
      %cst_39 = arith.constant dense<0xFF800000> : vector<8xf32>
      %151 = vector.multi_reduction <maximumf>, %150, %cst_39 [1] : vector<8x8xf32> to vector<8xf32>
      %152 = vector.shape_cast %151 : vector<8xf32> to vector<8x1xf32>
      %153 = vector.broadcast %152 : vector<8x1xf32> to vector<8x8xf32>
      %154 = arith.subf %150, %153 : vector<8x8xf32>
      %155 = math.exp %154 : vector<8x8xf32>
      %156 = arith.truncf %155 : vector<8x8xf32> to vector<8x8xbf16>
      %157 = vector.extract_strided_slice %138 {offsets = [0, 0], sizes = [8, 32], strides = [1, 1]} : vector<8x128xbf16> to vector<8x32xbf16>
      %158 = tpu.concatenate %157, %13 in 1 : vector<8x32xbf16>, vector<8x1xbf16> -> vector<8x33xbf16>
      %cst_40 = arith.constant dense<0.000000e+00> : vector<8x33xf32>
      %159 = tpu.matmul %156, %158, %cst_40 {dimension_numbers = #tpu.dot_dimension_numbers<[1], [0], [0], [1], [0, 0, 1, 1], [], []>} : vector<8x8xbf16>, vector<8x33xbf16>, vector<8x33xf32> -> vector<8x33xf32>
      %160 = vector.extract_strided_slice %159 {offsets = [0, 32], sizes = [8, 1], strides = [1, 1]} : vector<8x33xf32> to vector<8x1xf32>
      %161 = vector.extract_strided_slice %159 {offsets = [0, 0], sizes = [8, 32], strides = [1, 1]} : vector<8x33xf32> to vector<8x32xf32>
      %162 = tpu.reciprocal %160 {approx = true} : vector<8x1xf32> -> vector<8x1xf32>
      %163 = vector.broadcast %162 : vector<8x1xf32> to vector<8x32xf32>
      %164 = arith.mulf %161, %163 : vector<8x32xf32>
      %165 = vector.extract_strided_slice %141 {offsets = [0, 1], sizes = [8, 1], strides = [1, 1]} : vector<8x4xf32> to vector<8x1xf32>
      %166 = vector.extract_strided_slice %140 {offsets = [1, 0], sizes = [1, 8], strides = [1, 1]} : vector<4x8xf32> to vector<1x8xf32>
      %167 = vector.broadcast %165 : vector<8x1xf32> to vector<8x8xf32>
      %168 = vector.broadcast %166 : vector<1x8xf32> to vector<8x8xf32>
      %169 = arith.addf %167, %168 : vector<8x8xf32>
      %cst_41 = arith.constant 2.000000e-01 : f32
      %170 = vector.broadcast %cst_41 : f32 to vector<8x8xf32>
      %171 = arith.mulf %170, %169 : vector<8x8xf32>
      %172 = arith.maximumf %169, %171 : vector<8x8xf32>
      %173 = arith.addf %172, %11 : vector<8x8xf32>
      %cst_42 = arith.constant dense<0xFF800000> : vector<8xf32>
      %174 = vector.multi_reduction <maximumf>, %173, %cst_42 [1] : vector<8x8xf32> to vector<8xf32>
      %175 = vector.shape_cast %174 : vector<8xf32> to vector<8x1xf32>
      %176 = vector.broadcast %175 : vector<8x1xf32> to vector<8x8xf32>
      %177 = arith.subf %173, %176 : vector<8x8xf32>
      %178 = math.exp %177 : vector<8x8xf32>
      %179 = arith.truncf %178 : vector<8x8xf32> to vector<8x8xbf16>
      %180 = vector.extract_strided_slice %138 {offsets = [0, 32], sizes = [8, 32], strides = [1, 1]} : vector<8x128xbf16> to vector<8x32xbf16>
      %181 = tpu.concatenate %180, %13 in 1 : vector<8x32xbf16>, vector<8x1xbf16> -> vector<8x33xbf16>
      %cst_43 = arith.constant dense<0.000000e+00> : vector<8x33xf32>
      %182 = tpu.matmul %179, %181, %cst_43 {dimension_numbers = #tpu.dot_dimension_numbers<[1], [0], [0], [1], [0, 0, 1, 1], [], []>} : vector<8x8xbf16>, vector<8x33xbf16>, vector<8x33xf32> -> vector<8x33xf32>
      %183 = vector.extract_strided_slice %182 {offsets = [0, 32], sizes = [8, 1], strides = [1, 1]} : vector<8x33xf32> to vector<8x1xf32>
      %184 = vector.extract_strided_slice %182 {offsets = [0, 0], sizes = [8, 32], strides = [1, 1]} : vector<8x33xf32> to vector<8x32xf32>
      %185 = tpu.reciprocal %183 {approx = true} : vector<8x1xf32> -> vector<8x1xf32>
      %186 = vector.broadcast %185 : vector<8x1xf32> to vector<8x32xf32>
      %187 = arith.mulf %184, %186 : vector<8x32xf32>
      %188 = vector.extract_strided_slice %141 {offsets = [0, 2], sizes = [8, 1], strides = [1, 1]} : vector<8x4xf32> to vector<8x1xf32>
      %189 = vector.extract_strided_slice %140 {offsets = [2, 0], sizes = [1, 8], strides = [1, 1]} : vector<4x8xf32> to vector<1x8xf32>
      %190 = vector.broadcast %188 : vector<8x1xf32> to vector<8x8xf32>
      %191 = vector.broadcast %189 : vector<1x8xf32> to vector<8x8xf32>
      %192 = arith.addf %190, %191 : vector<8x8xf32>
      %cst_44 = arith.constant 2.000000e-01 : f32
      %193 = vector.broadcast %cst_44 : f32 to vector<8x8xf32>
      %194 = arith.mulf %193, %192 : vector<8x8xf32>
      %195 = arith.maximumf %192, %194 : vector<8x8xf32>
      %196 = arith.addf %195, %11 : vector<8x8xf32>
      %cst_45 = arith.constant dense<0xFF800000> : vector<8xf32>
      %197 = vector.multi_reduction <maximumf>, %196, %cst_45 [1] : vector<8x8xf32> to vector<8xf32>
      %198 = vector.shape_cast %197 : vector<8xf32> to vector<8x1xf32>
      %199 = vector.broadcast %198 : vector<8x1xf32> to vector<8x8xf32>
      %200 = arith.subf %196, %199 : vector<8x8xf32>
      %201 = math.exp %200 : vector<8x8xf32>
      %202 = arith.truncf %201 : vector<8x8xf32> to vector<8x8xbf16>
      %203 = vector.extract_strided_slice %138 {offsets = [0, 64], sizes = [8, 32], strides = [1, 1]} : vector<8x128xbf16> to vector<8x32xbf16>
      %204 = tpu.concatenate %203, %13 in 1 : vector<8x32xbf16>, vector<8x1xbf16> -> vector<8x33xbf16>
      %cst_46 = arith.constant dense<0.000000e+00> : vector<8x33xf32>
      %205 = tpu.matmul %202, %204, %cst_46 {dimension_numbers = #tpu.dot_dimension_numbers<[1], [0], [0], [1], [0, 0, 1, 1], [], []>} : vector<8x8xbf16>, vector<8x33xbf16>, vector<8x33xf32> -> vector<8x33xf32>
      %206 = vector.extract_strided_slice %205 {offsets = [0, 32], sizes = [8, 1], strides = [1, 1]} : vector<8x33xf32> to vector<8x1xf32>
      %207 = vector.extract_strided_slice %205 {offsets = [0, 0], sizes = [8, 32], strides = [1, 1]} : vector<8x33xf32> to vector<8x32xf32>
      %208 = tpu.reciprocal %206 {approx = true} : vector<8x1xf32> -> vector<8x1xf32>
      %209 = vector.broadcast %208 : vector<8x1xf32> to vector<8x32xf32>
      %210 = arith.mulf %207, %209 : vector<8x32xf32>
      %211 = vector.extract_strided_slice %141 {offsets = [0, 3], sizes = [8, 1], strides = [1, 1]} : vector<8x4xf32> to vector<8x1xf32>
      %212 = vector.extract_strided_slice %140 {offsets = [3, 0], sizes = [1, 8], strides = [1, 1]} : vector<4x8xf32> to vector<1x8xf32>
      %213 = vector.broadcast %211 : vector<8x1xf32> to vector<8x8xf32>
      %214 = vector.broadcast %212 : vector<1x8xf32> to vector<8x8xf32>
      %215 = arith.addf %213, %214 : vector<8x8xf32>
      %cst_47 = arith.constant 2.000000e-01 : f32
      %216 = vector.broadcast %cst_47 : f32 to vector<8x8xf32>
      %217 = arith.mulf %216, %215 : vector<8x8xf32>
      %218 = arith.maximumf %215, %217 : vector<8x8xf32>
      %219 = arith.addf %218, %11 : vector<8x8xf32>
      %cst_48 = arith.constant dense<0xFF800000> : vector<8xf32>
      %220 = vector.multi_reduction <maximumf>, %219, %cst_48 [1] : vector<8x8xf32> to vector<8xf32>
      %221 = vector.shape_cast %220 : vector<8xf32> to vector<8x1xf32>
      %222 = vector.broadcast %221 : vector<8x1xf32> to vector<8x8xf32>
      %223 = arith.subf %219, %222 : vector<8x8xf32>
      %224 = math.exp %223 : vector<8x8xf32>
      %225 = arith.truncf %224 : vector<8x8xf32> to vector<8x8xbf16>
      %226 = vector.extract_strided_slice %138 {offsets = [0, 96], sizes = [8, 32], strides = [1, 1]} : vector<8x128xbf16> to vector<8x32xbf16>
      %227 = tpu.concatenate %226, %13 in 1 : vector<8x32xbf16>, vector<8x1xbf16> -> vector<8x33xbf16>
      %cst_49 = arith.constant dense<0.000000e+00> : vector<8x33xf32>
      %228 = tpu.matmul %225, %227, %cst_49 {dimension_numbers = #tpu.dot_dimension_numbers<[1], [0], [0], [1], [0, 0, 1, 1], [], []>} : vector<8x8xbf16>, vector<8x33xbf16>, vector<8x33xf32> -> vector<8x33xf32>
      %229 = vector.extract_strided_slice %228 {offsets = [0, 32], sizes = [8, 1], strides = [1, 1]} : vector<8x33xf32> to vector<8x1xf32>
      %230 = vector.extract_strided_slice %228 {offsets = [0, 0], sizes = [8, 32], strides = [1, 1]} : vector<8x33xf32> to vector<8x32xf32>
      %231 = tpu.reciprocal %229 {approx = true} : vector<8x1xf32> -> vector<8x1xf32>
      %232 = vector.broadcast %231 : vector<8x1xf32> to vector<8x32xf32>
      %233 = arith.mulf %230, %232 : vector<8x32xf32>
      %234 = tpu.concatenate %164, %187, %210, %233 in 1 : vector<8x32xf32>, vector<8x32xf32>, vector<8x32xf32>, vector<8x32xf32> -> vector<8x128xf32>
      %c0_50 = arith.constant 0 : index
      %c0_51 = arith.constant 0 : index
      %235 = vector.load %arg6[%c0_50, %c0_51] : memref<1x128xf32, #tpu.memory_space<vmem>>, vector<1x128xf32>
      %236 = vector.broadcast %235 : vector<1x128xf32> to vector<8x128xf32>
      %237 = arith.addf %234, %236 : vector<8x128xf32>
      %cst_52 = arith.constant 0.000000e+00 : f32
      %238 = vector.broadcast %cst_52 : f32 to vector<8x128xf32>
      %239 = arith.cmpf ogt, %237, %238 : vector<8x128xf32>
      %cst_53 = arith.constant 0.000000e+00 : f32
      %240 = vector.broadcast %cst_53 : f32 to vector<8x128xf32>
      %241 = arith.minimumf %237, %240 : vector<8x128xf32>
      %242 = math.exp %241 : vector<8x128xf32>
      %cst_54 = arith.constant 1.000000e+00 : f32
      %243 = vector.broadcast %cst_54 : f32 to vector<8x128xf32>
      %244 = arith.subf %242, %243 : vector<8x128xf32>
      %245 = arith.select %239, %237, %244 : vector<8x128xi1>, vector<8x128xf32>
      %246 = arith.mulf %245, %245 : vector<8x128xf32>
      %cst_55 = arith.constant dense<0.000000e+00> : vector<8xf32>
      %247 = vector.multi_reduction <add>, %246, %cst_55 [1] : vector<8x128xf32> to vector<8xf32>
      %248 = vector.shape_cast %247 : vector<8xf32> to vector<8x1xf32>
      %249 = math.sqrt %248 : vector<8x1xf32>
      %cst_56 = arith.constant 9.99999996E-13 : f32
      %250 = vector.broadcast %cst_56 : f32 to vector<8x1xf32>
      %251 = arith.maximumf %249, %250 : vector<8x1xf32>
      %252 = vector.broadcast %251 : vector<8x1xf32> to vector<8x128xf32>
      %253 = arith.divf %245, %252 : vector<8x128xf32>
      %254 = vector.extract_strided_slice %253 {offsets = [7, 0], sizes = [1, 128], strides = [1, 1]} : vector<8x128xf32> to vector<1x128xf32>
      %255 = arith.truncf %254 : vector<1x128xf32> to vector<1x128xbf16>
      %c0_57 = arith.constant 0 : index
      %c0_58 = arith.constant 0 : index
      %256 = vector.load %arg7[%c0_57, %c0_58] : memref<128x32xbf16, #tpu.memory_space<vmem>>, vector<128x32xbf16>
      %cst_59 = arith.constant dense<0.000000e+00> : vector<1x32xf32>
      %257 = tpu.matmul %255, %256, %cst_59 {dimension_numbers = #tpu.dot_dimension_numbers<[1], [0], [0], [1], [0, 0, 1, 1], [], []>} : vector<1x128xbf16>, vector<128x32xbf16>, vector<1x32xf32> -> vector<1x32xf32>
      %c0_60 = arith.constant 0 : index
      %c0_61 = arith.constant 0 : index
      %258 = vector.load %arg8[%c0_60, %c0_61] : memref<1x32xf32, #tpu.memory_space<vmem>>, vector<1x32xf32>
      %259 = arith.addf %257, %258 : vector<1x32xf32>
      %cst_62 = arith.constant 0.000000e+00 : f32
      %260 = vector.broadcast %cst_62 : f32 to vector<1x32xf32>
      %261 = arith.maximumf %259, %260 : vector<1x32xf32>
      %c0_63 = arith.constant 0 : index
      %c0_64 = arith.constant 0 : index
      %262 = vector.load %arg12[%c0_63, %c0_64] : memref<1x32xf32, #tpu.memory_space<vmem>>, vector<1x32xf32>
      tpu.vector_store %arg12[%c0_63, %c0_64], %261 {strides = array<i32>} : memref<1x32xf32, #tpu.memory_space<vmem>>, vector<1x32xf32>,
    } else {
    }
    %c0 = arith.constant 0 : index
    %c0_1 = arith.constant 0 : index
    %3 = vector.load %arg12[%c0, %c0_1] : memref<1x32xf32, #tpu.memory_space<vmem>>, vector<1x32xf32>
    %4 = arith.truncf %3 : vector<1x32xf32> to vector<1x32xbf16>
    %c0_2 = arith.constant 0 : index
    %c0_3 = arith.constant 0 : index
    %5 = vector.load %arg9[%c0_2, %c0_3] : memref<32x128xbf16, #tpu.memory_space<vmem>>, vector<32x128xbf16>
    %cst = arith.constant dense<0.000000e+00> : vector<1x128xf32>
    %6 = tpu.matmul %4, %5, %cst {dimension_numbers = #tpu.dot_dimension_numbers<[1], [0], [0], [1], [0, 0, 1, 1], [], []>} : vector<1x32xbf16>, vector<32x128xbf16>, vector<1x128xf32> -> vector<1x128xf32>
    %c0_4 = arith.constant 0 : index
    %c0_5 = arith.constant 0 : index
    %7 = vector.load %arg10[%c0_4, %c0_5] : memref<1x128xf32, #tpu.memory_space<vmem>>, vector<1x128xf32>
    %8 = arith.addf %6, %7 : vector<1x128xf32>
    %c0_6 = arith.constant 0 : index
    %c0_7 = arith.constant 0 : index
    %9 = vector.load %arg11[%c0_6, %c0_7] : memref<1x128xf32, #tpu.memory_space<vmem>>, vector<1x128xf32>
    tpu.vector_store %arg11[%c0_6, %c0_7], %8 {strides = array<i32>} : memref<1x128xf32, #tpu.memory_space<vmem>>, vector<1x128xf32>,
    return
  }
  func.func @transform_0(%arg0: i32) -> (i32, i32) {
    %c0_i32 = arith.constant 0 : i32
    %c0_i32_0 = arith.constant 0 : i32
    %c0_i32_1 = arith.constant 0 : i32
    return %c0_i32, %c0_i32_0 : i32, i32
  }
  func.func @transform_1(%arg0: i32) -> (i32, i32) {
    %c0_i32 = arith.constant 0 : i32
    %c0_i32_0 = arith.constant 0 : i32
    %c0_i32_1 = arith.constant 0 : i32
    return %c0_i32, %c0_i32_0 : i32, i32
  }
  func.func @transform_2(%arg0: i32) -> (i32, i32) {
    %c0_i32 = arith.constant 0 : i32
    %c0_i32_0 = arith.constant 0 : i32
    %c0_i32_1 = arith.constant 0 : i32
    return %c0_i32, %c0_i32_0 : i32, i32
  }
  func.func @transform_3(%arg0: i32) -> (i32, i32) {
    %c0_i32 = arith.constant 0 : i32
    %c0_i32_0 = arith.constant 0 : i32
    %c0_i32_1 = arith.constant 0 : i32
    return %c0_i32, %c0_i32_0 : i32, i32
  }
  func.func @transform_4(%arg0: i32) -> (i32, i32) {
    %c0_i32 = arith.constant 0 : i32
    %c0_i32_0 = arith.constant 0 : i32
    %c0_i32_1 = arith.constant 0 : i32
    return %c0_i32, %c0_i32_0 : i32, i32
  }
  func.func @transform_5(%arg0: i32) -> (i32, i32) {
    %c0_i32 = arith.constant 0 : i32
    %c0_i32_0 = arith.constant 0 : i32
    %c0_i32_1 = arith.constant 0 : i32
    return %c0_i32, %c0_i32_0 : i32, i32
  }
  func.func @transform_6(%arg0: i32) -> (i32, i32) {
    %c0_i32 = arith.constant 0 : i32
    %c0_i32_0 = arith.constant 0 : i32
    %c0_i32_1 = arith.constant 0 : i32
    return %c0_i32, %c0_i32_0 : i32, i32
  }
  func.func @transform_7(%arg0: i32) -> (i32, i32) {
    %c0_i32 = arith.constant 0 : i32
    %c0_i32_0 = arith.constant 0 : i32
    %c0_i32_1 = arith.constant 0 : i32
    return %c0_i32, %c0_i32_0 : i32, i32
  }
  func.func @transform_8(%arg0: i32) -> (i32, i32) {
    %c0_i32 = arith.constant 0 : i32
    %c0_i32_0 = arith.constant 0 : i32
    return %c0_i32, %arg0 : i32, i32
  }
  func.func @transform_9(%arg0: i32) -> (i32, i32) {
    %c0_i32 = arith.constant 0 : i32
    %c0_i32_0 = arith.constant 0 : i32
    return %c0_i32, %arg0 : i32, i32
  }
  func.func @transform_10(%arg0: i32) -> (i32, i32) {
    %c0_i32 = arith.constant 0 : i32
    %c0_i32_0 = arith.constant 0 : i32
    return %c0_i32, %arg0 : i32, i32
  }
}

</mosaic_0001>

<bundles_post_ra>
// kernel: tpu_custom_call.1
= control target key start
LH: loop header
LB: loop body
LE: loop exit
PB: predicated region body
PF: predicated region fallthrough
CT: control target
= control target key end

     0   :  { %v1477_v2 = vmov 0   ;;  %vm70_vm0 = vcmask 261120   ;;  %s1796_s0 = inlined_call_operand.vmem [shape: f32[8,32], index: 0, kind: input, shape index: {}]   ;;  %s1797_s1 = inlined_call_operand.vmem [shape: bf16[8,8], index: 1, kind: input, shape index: {}]   ;;  %s1798_s2 = inlined_call_operand.vmem [shape: bf16[32,136], index: 2, kind: input, shape index: {}]   ;;  %s1799_s3 = inlined_call_operand.vmem [shape: f32[1,128], index: 3, kind: input, shape index: {}]   ;;  %s1800_s4 = inlined_call_operand.vmem [shape: bf16[128,136], index: 4, kind: input, shape index: {}]   ;;  %s1801_s5 = inlined_call_operand.vmem [shape: f32[1,128], index: 5, kind: input, shape index: {}]   ;;  %s1802_s6 = inlined_call_operand.vmem [shape: bf16[128,32], index: 6, kind: input, shape index: {}]   ;;  %s1803_s7 = inlined_call_operand.vmem [shape: f32[1,32], index: 7, kind: input, shape index: {}]   ;;  %s1804_s8 = inlined_call_operand.vmem [shape: bf16[32,128], index: 8, kind: input, shape index: {}]   ;;  %s1805_s9 = inlined_call_operand.vmem [shape: f32[1,128], index: 9, kind: input, shape index: {}]   ;;  %s1806_s10 = inlined_call_operand.hbm [shape: f32[1,128], index: 10, kind: output, shape index: {}]  }
   0x1   :  { %v1371_v0 = vld [vmem:[%s1798_s2 + $0x14] ss:$8 sps:$4 sm:$0xff]   ;;  %v1373_v1 = vld [vmem:[%s1798_s2 + $0x10] ss:$8 sps:$4 sm:$0xff]   ;;  %106 = vmatprep.mubr.bf16.mxu1 %v1477_v2  ;;  %v1374_v3 = vld [vmem:[%s1798_s2 + $0x4] ss:$8 sps:$4 sm:$0xff]  }
   0x2   :  { %86 = vmatprep.subr.bf16.mxu1 %v1371_v0  ;;  %v1376_v4 = vld [vmem:[%s1798_s2] ss:$8 sps:$4 sm:$0xff]  }
   0x3   :  { %v44_v5 = vld [vmem:[%s1796_s0] sm:$0xff]  ;;  %87 = vmatpush1.bf16.msra.mxu1 %v1373_v1 }
   0x4   :  { %88 = vmatprep.subr.bf16.mxu1 %v1374_v3  ;;  %v45_v6 = vpack.c.bf16 %v44_v5, %v44_v5 }
   0x7   :  { %89 = vmatpush1.bf16.msra.mxu1 %v1376_v4 }
   0xa   :  { %1204 = vmatmul.mubr.msk.bf16.vlgmr.msra.gmra.mxu1 %vm70_vm0, %v45_v6 }
   0xb   :  { %15 = vsyncpa [#allocation4], 0  ;;  %v1478_v7 = vmov 6   ;;  %v1479_v8 = vmov 4   ;;  %v1480_v9 = vmov 0.0   ;;  %vm175_vm1 = vcmask 1043456  }
   0xc   :  { %1362 = vset.pattern.permute.xlu1 %v1478_v7  ;;  %1360 = vset.pattern.permute.xlu0 %v1479_v8  ;;  %v1481_v17 = vmov 7   ;;  %v1482_v18 = vmov 5   ;;  %v153_v19 = vlaneseq  ;;  %v42_v34 = vld [vmem:[%s1797_s1] sm:$0xf]  ;;  %vm161_vm2 = vcmask 64512   ;;  %s1483_s1 = smov 96  }
   0xd   :  { %1272 = vmatprep.subr.bf16.mxu1 %v1480_v9  ;;  %1284 = vmatprep.subr.bf16.mxu0 %v1480_v9  ;;  %v1590_v39 = vunpack.c.l.bf16 %v42_v34  ;;  %vm1484_vm3 = vmmov 0   ;;  %s1485_s23 = smov 64   ;;  %s1486_s24 = smov 32   ;;  %vm464_vm4 = vcmask 523264   ;;  %vm466_vm5 = vcmask 785408  }
   0xe   :  { %v1573_v21 = vshrl.u32 %v153_v19, 7  ;;  %1274 = vmatprep.mubr.msk.bf16.mxu1 %vm1484_vm3, %v1480_v9  ;;  %1286 = vmatprep.mubr.msk.bf16.mxu0 %vm1484_vm3, %v1480_v9  ;;  %vm1120_vm12 = vcmask 253952   ;;  %s1488_s15 = smov [#allocation3]  }
   0xf   :  { %s1192_s16 = sshll.u32 %s1488_s15, 4  ;;  %s1193_s16 = int_to_ptr.vmem [resolvable:$true] %s1192_s16 }
  0x10   :  { %v155_v24 = vsub.s32 0, %v1573_v21  ;;  %v231_v25 = vsub.s32 1, %v1573_v21  ;;  %v307_v26 = vsub.s32 2, %v1573_v21  ;;  %v382_v27 = vsub.s32 3, %v1573_v21  ;;  %p1460_p1 = scmp.lt.s32.totalorder %s1193_s16, %s1193_s16 }
  0xca   :  { %v108_v10 = vpop.f32.mrf.mxu1 }
  0xcb   :  { %v1565_v11 = vpack.c.bf16 %v108_v10, %v108_v10 }
  0xcc   :  { %v110_v12 = vpop.f32.mrf.mxu1 }
  0xcd   :  { %302 = vperm.xlu1 %1362, %v110_v12   ;;  %150 = vperm.xlu0 %1360, %v110_v12   ;;  %v171_v13 = vsel %vm70_vm0, %v1565_v11, 1065369472 }
  0xce   :  { %v112_v14 = vpop.f32.mrf.mxu1  ;;  %v176_v15 = vsel %vm175_vm1, %v171_v13, 0 }
  0xcf   :  { %1273 = vmatpush3.bf16.msra.mxu1 %v176_v15 }
  0xd0   :  { %v113_v16 = vpop.f32.mrf.mxu1  ;;  %1278 = vmatprep.subr.bf16.mxu1 %v1480_v9 }
  0xd1   :  { %1363 = vset.pattern.permute.xlu1 %v1481_v17  ;;  %1361 = vset.pattern.permute.xlu0 %v1482_v18 }
  0xd2   :  { %377 = vperm.xlu1 %1363, %v110_v12   ;;  %226 = vperm.xlu0 %1361, %v110_v12  }
  0xfb   :  { %116 = vxpose.xlu1.b32.start.end [1/1] (short) (narrow) %v110_v12, 8 }
 0x148   :  { %v303_v20 = vpop.permute.xlu1 %302  ;;  %v151_v22 = vpop.permute.xlu0 %150 }
 0x14d   :  { %v378_v23 = vpop.permute.xlu1 %377  ;;  %v227_v33 = vpop.permute.xlu0 %226 }
 0x177   :  { %v132_v28 = vpop.trf.xlu1 }
 0x178   :  { %v156_v29 = vrot.slane %v132_v28, %v155_v24  ;;  %v232_v30 = vrot.slane %v132_v28, %v231_v25  ;;  %v308_v31 = vrot.slane %v132_v28, %v307_v26  ;;  %v383_v32 = vrot.slane %v132_v28, %v382_v27 }
 0x17a   :  { %v384_v35 = vadd.f32 %v383_v32, %v378_v23  ;;  %v157_v36 = vadd.f32 %v156_v29, %v151_v22  ;;  %v233_v37 = vadd.f32 %v232_v30, %v227_v33  ;;  %v309_v38 = vadd.f32 %v308_v31, %v303_v20 }
 0x17b   :  { %v1487_v32 = vmov 32  }
 0x17c   :  { %v385_v40 = vmul.f32 0.2, %v384_v35  ;;  %v158_v41 = vmul.f32 0.2, %v157_v36  ;;  %v234_v42 = vmul.f32 0.2, %v233_v37  ;;  %1364 = vset.pattern.permute.xlu1 %v1487_v32  ;;  %1365 = vset.pattern.permute.xlu0 %v1487_v32 }
 0x17d   :  { %v310_v46 = vmul.f32 0.2, %v309_v38 }
 0x17e   :  { %v386_v43 = vmax.f32 %v384_v35, %v385_v40  ;;  %v159_v44 = vmax.f32 %v157_v36, %v158_v41  ;;  %v235_v45 = vmax.f32 %v233_v37, %v234_v42 }
 0x17f   :  { %v311_v52 = vmax.f32 %v309_v38, %v310_v46 }
 0x180   :  { %v387_v47 = vadd.f32 %v386_v43, %v1590_v39  ;;  %v160_v48 = vadd.f32 %v159_v44, %v1590_v39  ;;  %v236_v51 = vadd.f32 %v235_v45, %v1590_v39 }
 0x181   :  { %v312_v54 = vadd.f32 %v311_v52, %v1590_v39 }
 0x182   :  { %v388_v49 = vsel %vm161_vm2, %v387_v47, -inf  ;;  %v162_v50 = vsel %vm161_vm2, %v160_v48, -inf  ;;  %v237_v53 = vsel %vm161_vm2, %v236_v51, -inf }
 0x183   :  { %389 = vmax.xlane.f32.xlu1 %v388_v49  ;;  %163 = vmax.xlane.f32.xlu0 %v162_v50  ;;  %v313_v55 = vsel %vm161_vm2, %v312_v54, -inf }
 0x187   :  { %238 = vmax.xlane.f32.xlu0 %v237_v53 }
 0x18b   :  { %314 = vmax.xlane.f32.xlu0 %v313_v55 }
 0x1a1   :  { %245 = vrot.lane.b32.xlu0 %v1565_v11, %s1483_s1 }
 0x1a5   :  { %320 = vrot.lane.b32.xlu0 %v1565_v11, %s1485_s23 }
 0x1a9   :  { %395 = vrot.lane.b32.xlu0 %v1565_v11, %s1486_s24 }
 0x20c   :  { %v164_v56 = vpop.xlane.xlu0 %163  ;;  %v390_v63 = vpop.xlane.xlu1 %389 }
 0x20d   :  { %v165_v57 = vsub.f32 %v160_v48, %v164_v56  ;;  %v391_v3 = vsub.f32 %v387_v47, %v390_v63 }
 0x20f   :  { %v166_v58 = vmul.f32 1.442695, %v165_v57  ;;  %v392_v5 = vmul.f32 1.442695, %v391_v3 }
 0x210   :  { %v239_v59 = vpop.xlane.xlu0 %238 }
 0x211   :  { %v240_v60 = vsub.f32 %v236_v51, %v239_v59  ;;  %1411 = vpow2.f32 %v166_v58 }
 0x213   :  { %v241_v61 = vmul.f32 1.442695, %v240_v60 }
 0x214   :  { %v315_v62 = vpop.xlane.xlu0 %314 }
 0x215   :  { %v316_v0 = vsub.f32 %v312_v54, %v315_v62  ;;  %1413 = vpow2.f32 %v241_v61 }
 0x217   :  { %v317_v1 = vmul.f32 1.442695, %v316_v0 }
 0x218   :  { %v246_v4 = vpop.permute.xlu0 %245 }
 0x219   :  { %1415 = vpow2.f32 %v317_v1  ;;  %v248_v13 = vsel %vm70_vm0, %v246_v4, 1065369472 }
 0x21a   :  { %1417 = vpow2.f32 %v392_v5  ;;  %v252_v15 = vsel %vm175_vm1, %v248_v13, 0 }
 0x21c   :  { %v321_v6 = vpop.permute.xlu0 %320 }
 0x21d   :  { %v323_v10 = vsel %vm70_vm0, %v321_v6, 1065369472 }
 0x21e   :  { %v327_v11 = vsel %vm175_vm1, %v323_v10, 0  ;;  %v1412_v12 = vpop.eup %1411 }
 0x21f   :  { %1285 = vmatpush3.bf16.msra.mxu0 %v327_v11  ;;  %v168_v14 = vpack.c.bf16 %v1412_v12, %v1412_v12 }
 0x220   :  { %v396_v16 = vpop.permute.xlu0 %395 }
 0x221   :  { %1275 = vmatmul.mubr.msk.bf16.vlgmr.msra.gmra.mxu1 %vm161_vm2, %v168_v14  ;;  %v398_v23 = vsel %vm70_vm0, %v396_v16, 1065369472  ;;  %v1379_v14 = vld [vmem:[%s1800_s4 + $0x74] ss:$8 sps:$4 sm:$0xff]   ;;  %v1382_v16 = vld [vmem:[%s1800_s4 + $0x64] ss:$8 sps:$4 sm:$0xff]  }
 0x222   :  { %1279 = vmatpush3.bf16.msra.mxu1 %v252_v15  ;;  %1280 = vmatprep.mubr.msk.bf16.mxu1 %vm1484_vm3, %v1480_v9  ;;  %v1414_v19 = vpop.eup %1413  ;;  %v402_v29 = vsel %vm175_vm1, %v398_v23, 0  ;;  %v1377_v15 = vld [vmem:[%s1800_s4 + $0x70] ss:$8 sps:$4 sm:$0xff]   ;;  %v1388_v23 = vld [vmem:[%s1800_s4 + $0x44] ss:$8 sps:$4 sm:$0xff]  }
 0x223   :  { %1290 = vmatprep.subr.bf16.mxu1 %v1480_v9  ;;  %v243_v28 = vpack.c.bf16 %v1414_v19, %v1414_v19  ;;  %592 = vmatprep.subr.bf16.mxu0 %v1379_v14  ;;  %v1380_v19 = vld [vmem:[%s1800_s4 + $0x60] ss:$8 sps:$4 sm:$0xff]  }
 0x226   :  { %v1416_v20 = vpop.eup %1415 }
 0x227   :  { %v319_v22 = vpack.c.bf16 %v1416_v20, %v1416_v20  ;;  %v1418_v30 = vpop.eup %1417  ;;  %v1385_v20 = vld [vmem:[%s1800_s4 + $0x54] ss:$8 sps:$4 sm:$0xff]  }
 0x228   :  { %v394_v31 = vpack.c.bf16 %v1418_v30, %v1418_v30  ;;  %v1391_v30 = vld [vmem:[%s1800_s4 + $0x34] ss:$8 sps:$4 sm:$0xff]  }
 0x229   :  { %1287 = vmatmul.mubr.msk.bf16.vlgmr.msra.gmra.mxu0 %vm161_vm2, %v319_v22  ;;  %1281 = vmatmul.mubr.msk.bf16.vlgmr.msra.gmra.mxu1 %vm161_vm2, %v243_v28  ;;  %v1383_v22 = vld [vmem:[%s1800_s4 + $0x50] ss:$8 sps:$4 sm:$0xff]   ;;  %v1386_v28 = vld [vmem:[%s1800_s4 + $0x40] ss:$8 sps:$4 sm:$0xff]  }
 0x22a   :  { %624 = vmatprep.mubr.bf16.mxu0 %v1477_v2  ;;  %1291 = vmatpush3.bf16.msra.mxu1 %v402_v29  ;;  %v1389_v29 = vld [vmem:[%s1800_s4 + $0x30] ss:$8 sps:$4 sm:$0xff]  }
 0x22b   :  { %1292 = vmatprep.mubr.msk.bf16.mxu1 %vm1484_vm3, %v1480_v9  ;;  %1296 = vmatprep.subr.bf16.mxu1 %v1480_v9 }
 0x22c   :  { %593 = vmatpush1.bf16.msra.mxu0 %v1377_v15 }
 0x22d   :  { %594 = vmatprep.subr.bf16.mxu0 %v1382_v16 }
 0x230   :  { %595 = vmatpush1.bf16.msra.mxu0 %v1380_v19 }
 0x231   :  { %1293 = vmatmul.mubr.msk.bf16.vlgmr.msra.gmra.mxu1 %vm161_vm2, %v394_v31  ;;  %596 = vmatprep.subr.bf16.mxu0 %v1385_v20  ;;  %v1394_v31 = vld [vmem:[%s1800_s4 + $0x24] ss:$8 sps:$4 sm:$0xff]  }
 0x232   :  { %1298 = vmatprep.mubr.msk.bf16.mxu1 %vm1484_vm3, %v1480_v9 }
 0x234   :  { %597 = vmatpush1.bf16.msra.mxu0 %v1383_v22 }
 0x235   :  { %598 = vmatprep.subr.bf16.mxu0 %v1388_v23 }
 0x238   :  { %599 = vmatpush1.bf16.msra.mxu0 %v1386_v28 }
 0x239   :  { %600 = vmatprep.subr.bf16.mxu0 %v1391_v30 }
 0x23c   :  { %601 = vmatpush1.bf16.msra.mxu0 %v1389_v29 }
 0x23d   :  { %602 = vmatprep.subr.bf16.mxu0 %v1394_v31 }
 0x2e1   :  { %v212_v33 = vpop.f32.mrf.mxu1 }
 0x2e3   :  { %v1276_v2 = vpop.f32.mrf.mxu1 }
 0x2e4   :  { %v1397_v2 = vld [vmem:[%s1800_s4 + $0x14] ss:$8 sps:$4 sm:$0xff]  }
 0x2e5   :  { %v215_v34 = vpop.f32.mrf.mxu1 }
 0x2e6   :  { %v1395_v34 = vld [vmem:[%s1800_s4 + $0x10] ss:$8 sps:$4 sm:$0xff]  }
 0x2e7   :  { %v1277_v35 = vpop.f32.mrf.mxu1 }
 0x2e8   :  { %v1400_v35 = vld [vmem:[%s1800_s4 + $0x4] ss:$8 sps:$4 sm:$0xff]  }
 0x2e9   :  { %v363_v36 = vpop.f32.mrf.mxu0  ;;  %v288_v37 = vpop.f32.mrf.mxu1 }
 0x2ea   :  { %1419 = vrcp.f32 %v363_v36 }
 0x2eb   :  { %1421 = vrcp.f32 %v288_v37  ;;  %v1288_v38 = vpop.f32.mrf.mxu0  ;;  %v1282_v40 = vpop.f32.mrf.mxu1 }
 0x2ed   :  { %v366_v41 = vpop.f32.mrf.mxu0  ;;  %v291_v42 = vpop.f32.mrf.mxu1 }
 0x2ef   :  { %v1289_v43 = vpop.f32.mrf.mxu0  ;;  %v1283_v44 = vpop.f32.mrf.mxu1 }
 0x2f1   :  { %v438_v45 = vpop.f32.mrf.mxu1 }
 0x2f2   :  { %1423 = vrcp.f32 %v438_v45 }
 0x2f3   :  { %v1294_v46 = vpop.f32.mrf.mxu1  ;;  %1425 = vrcp.f32 %v212_v33 }
 0x2f5   :  { %v441_v47 = vpop.f32.mrf.mxu1 }
 0x2f7   :  { %v1420_v48 = vpop.eup %1419  ;;  %v1295_v50 = vpop.f32.mrf.mxu1 }
 0x2f8   :  { %v1422_v49 = vpop.eup %1421  ;;  %372 = vperm.xlu1 %1364, %v1420_v48  }
 0x2f9   :  { %297 = vperm.xlu0 %1365, %v1422_v49  }
 0x2ff   :  { %v1424_v51 = vpop.eup %1423 }
 0x300   :  { %447 = vperm.xlu0 %1365, %v1424_v51   ;;  %v1426_v52 = vpop.eup %1425 }
 0x304   :  { %221 = vperm.xlu0 %1365, %v1426_v52  }
 0x308   :  { %1366 = vset.pattern.permute.xlu0 %v1479_v8  ;;  %v1209_v8 = vld [vmem:[%s1799_s3] ss:$0 sm:$0xff] }
 0x373   :  { %v373_v53 = vpop.permute.xlu1 %372 }
 0x374   :  { %v375_v54 = vmul.f32 %v373_v53, %v363_v36  ;;  %v298_v55 = vpop.permute.xlu0 %297  ;;  %v1398_v36 = vld [vmem:[%s1800_s4] ss:$8 sps:$4 sm:$0xff]  }
 0x375   :  { %v300_v56 = vmul.f32 %v298_v55, %v288_v37 }
 0x376   :  { %456 = vrot.lane.b32.xlu0 %v375_v54, %s1485_s23 }
 0x37a   :  { %452 = vrot.lane.b32.xlu0 %v300_v56, %s1486_s24 }
 0x37b   :  { %v448_v57 = vpop.permute.xlu0 %447 }
 0x37c   :  { %v450_v58 = vmul.f32 %v448_v57, %v438_v45 }
 0x37e   :  { %460 = vrot.lane.b32.xlu0 %v450_v58, %s1483_s1 }
 0x37f   :  { %v222_v59 = vpop.permute.xlu0 %221 }
 0x380   :  { %v224_v61 = vmul.f32 %v222_v59, %v212_v33  ;;  %v1392_v33 = vld [vmem:[%s1800_s4 + $0x20] ss:$8 sps:$4 sm:$0xff]   ;;  %s1459_s4 = scalar_lea.vmem %s1193_s16, 32 }
 0x381   :  { %603 = vmatpush1.bf16.msra.mxu0 %v1392_v33 }
 0x382   :  { %604 = vmatprep.subr.bf16.mxu0 %v1397_v2 }
 0x385   :  { %605 = vmatpush1.bf16.msra.mxu0 %v1395_v34 }
 0x386   :  { %606 = vmatprep.subr.bf16.mxu0 %v1400_v35 }
 0x389   :  { %607 = vmatpush1.bf16.msra.mxu0 %v1398_v36 }
 0x38a   :  { %1320 = vmatprep.subr.bf16.mxu0 %v1480_v9 }
 0x3e8   :  { %v457_v60 = vpop.permute.xlu0 %456 }
 0x3ec   :  { %v453_v62 = vpop.permute.xlu0 %452 }
 0x3ed   :  { %v463_v63 = vsel %vm70_vm0, %v224_v61, %v453_v62 }
 0x3ee   :  { %v465_v0 = vsel %vm464_vm4, %v463_v63, %v457_v60 }
 0x3f0   :  { %v461_v1 = vpop.permute.xlu0 %460 }
 0x3f1   :  { %v467_v3 = vsel %vm466_vm5, %v465_v0, %v461_v1 }
 0x3f2   :  { %v475_v4 = vadd.f32 %v1209_v8, %v467_v3 }
 0x3f4   :  { %v477_v5 = vmin.f32 %v475_v4, 0.0  ;;  %vm476_vm6 = vcmp.gt.f32.partialorder %v475_v4, 0.0 }
 0x3f6   :  { %v478_v6 = vmul.f32 1.442695, %v477_v5 }
 0x3f8   :  { %1427 = vpow2.f32 %v478_v6 }
 0x405   :  { %v1428_v10 = vpop.eup %1427 }
 0x406   :  { %v1210_v11 = vadd.f32 -1.0, %v1428_v10 }
 0x408   :  { %v481_v12 = vsel %vm476_vm6, %v475_v4, %v1210_v11 }
 0x409   :  { %v482_v13 = vmul.f32 %v481_v12, %v481_v12 }
 0x40b   :  { %483 = vadd.xlane.f32.xlu1 %v482_v13 }
 0x494   :  { %v484_v37 = vpop.xlane.xlu1 %483 }
 0x495   :  { %1429 = vrsqrt.f32 %v484_v37  ;;  %vm487_vm7 = vcmp.eq.f32.partialorder %v484_v37, inf  ;;  %v490_v41 = vand.u32 2147483648, %v484_v37  ;;  %vm489_vm8 = vcmp.eq.f32.partialorder %v484_v37, 0.0 }
 0x4a2   :  { %v1430_v38 = vpop.eup %1429 }
 0x4a3   :  { %v486_v40 = vmul.f32 %v1430_v38, %v484_v37 }
 0x4a5   :  { %v488_v42 = vsel %vm487_vm7, %v484_v37, %v486_v40 }
 0x4a6   :  { %v491_v43 = vsel %vm489_vm8, %v490_v41, %v488_v42 }
 0x4a7   :  { %v492_v44 = vmax.f32 %v491_v43, 1e-12 }
 0x4a9   :  { %1431 = vrcp.f32 %v492_v44 }
 0x4b6   :  { %v1432_v45 = vpop.eup %1431 }
 0x4b7   :  { %v494_v46 = vmul.f32 %v1432_v45, %v481_v12 }
 0x4b9   :  { %v495_v47 = vpack.c.bf16 %v494_v46, %v494_v46 }
 0x4bb   :  { %625 = vmatmul.mubr.bf16.vlgmr.msra.gmra.mxu0 %v495_v47 }
 0x4bc   :  { %1336 = vmatprep.mubr.msk.bf16.mxu0 %vm1484_vm3, %v1480_v9 }
 0x57b   :  { %v626_v48 = vpop.f32.mrf.mxu0 }
 0x57c   :  { %v633_v49 = vpack.c.bf16 %v626_v48, %v626_v48 }
 0x57d   :  { %v628_v50 = vpop.f32.mrf.mxu0 }
 0x57e   :  { %668 = vperm.xlu0 %1366, %v628_v50   ;;  %v687_v51 = vsel %vm70_vm0, %v633_v49, 1065369472 }
 0x57f   :  { %v630_v52 = vpop.f32.mrf.mxu0  ;;  %v691_v53 = vsel %vm175_vm1, %v687_v51, 0 }
 0x580   :  { %1297 = vmatpush3.bf16.msra.mxu1 %v691_v53 }
 0x581   :  { %v631_v54 = vpop.f32.mrf.mxu0  ;;  %1302 = vmatprep.subr.bf16.mxu1 %v1480_v9 }
 0x582   :  { %1367 = vset.pattern.permute.xlu0 %v1482_v18 }
 0x583   :  { %741 = vperm.xlu0 %1367, %v628_v50  }
 0x587   :  { %1368 = vset.pattern.permute.xlu0 %v1478_v7 }
 0x588   :  { %817 = vperm.xlu0 %1368, %v628_v50  }
 0x58c   :  { %1369 = vset.pattern.permute.xlu0 %v1481_v17 }
 0x58d   :  { %892 = vperm.xlu0 %1369, %v628_v50  }
 0x5ab   :  { %634 = vxpose.xlu0.b32.start.end [1/1] (short) (narrow) %v628_v50, 8 }
 0x5d4   :  { %835 = vrot.lane.b32.xlu0 %v633_v49, %s1485_s23 }
 0x5d5   :  { %1370 = vset.pattern.permute.xlu0 %v1487_v32 }
 0x5f9   :  { %v669_v55 = vpop.permute.xlu0 %668 }
 0x5fe   :  { %v742_v56 = vpop.permute.xlu0 %741 }
 0x603   :  { %v818_v57 = vpop.permute.xlu0 %817 }
 0x608   :  { %v893_v58 = vpop.permute.xlu0 %892 }
 0x627   :  { %v650_v59 = vpop.trf.xlu0 }
 0x628   :  { %v674_v18 = vrot.slane %v650_v59, %v155_v24  ;;  %v747_v32 = vrot.slane %v650_v59, %v231_v25  ;;  %v823_v63 = vrot.slane %v650_v59, %v307_v26  ;;  %v898_v24 = vrot.slane %v650_v59, %v382_v27 }
 0x62a   :  { %v675_v60 = vadd.f32 %v674_v18, %v669_v55  ;;  %v748_v8 = vadd.f32 %v747_v32, %v742_v56  ;;  %v824_v1 = vadd.f32 %v823_v63, %v818_v57  ;;  %v899_v5 = vadd.f32 %v898_v24, %v893_v58 }
 0x62c   :  { %v676_v61 = vmul.f32 0.2, %v675_v60  ;;  %v749_v0 = vmul.f32 0.2, %v748_v8  ;;  %v825_v4 = vmul.f32 0.2, %v824_v1 }
 0x62d   :  { %v900_v11 = vmul.f32 0.2, %v899_v5 }
 0x62e   :  { %v677_v7 = vmax.f32 %v675_v60, %v676_v61  ;;  %v750_v3 = vmax.f32 %v748_v8, %v749_v0  ;;  %v826_v10 = vmax.f32 %v824_v1, %v825_v4 }
 0x62f   :  { %v901_v13 = vmax.f32 %v899_v5, %v900_v11 }
 0x630   :  { %v678_v62 = vadd.f32 %v677_v7, %v1590_v39  ;;  %v751_v6 = vadd.f32 %v750_v3, %v1590_v39  ;;  %v827_v25 = vadd.f32 %v826_v10, %v1590_v39 }
 0x631   :  { %v902_v21 = vadd.f32 %v901_v13, %v1590_v39 }
 0x632   :  { %v679_v17 = vsel %vm161_vm2, %v678_v62, -inf  ;;  %v752_v12 = vsel %vm161_vm2, %v751_v6, -inf  ;;  %v828_v26 = vsel %vm161_vm2, %v827_v25, -inf }
 0x633   :  { %680 = vmax.xlane.f32.xlu1 %v679_v17  ;;  %v903_v27 = vsel %vm161_vm2, %v902_v21, -inf }
 0x644   :  { %760 = vrot.lane.b32.xlu1 %v633_v49, %s1483_s1 }
 0x646   :  { %v836_v36 = vpop.permute.xlu0 %835 }
 0x647   :  { %v838_v40 = vsel %vm70_vm0, %v836_v36, 1065369472 }
 0x648   :  { %v842_v42 = vsel %vm175_vm1, %v838_v40, 0 }
 0x668   :  { %753 = vmax.xlane.f32.xlu1 %v752_v12 }
 0x66c   :  { %829 = vmax.xlane.f32.xlu1 %v828_v26  ;;  %v1231_v26 = vld [vmem:[%s1801_s5] ss:$0 sm:$0xff] }
 0x670   :  { %904 = vmax.xlane.f32.xlu1 %v903_v27 }
 0x681   :  { %910 = vrot.lane.b32.xlu1 %v633_v49, %s1486_s24 }
 0x6bc   :  { %v681_v14 = vpop.xlane.xlu1 %680 }
 0x6bd   :  { %v682_v15 = vsub.f32 %v678_v62, %v681_v14 }
 0x6bf   :  { %v683_v16 = vmul.f32 1.442695, %v682_v15 }
 0x6c0   :  { %v761_v19 = vpop.permute.xlu1 %760 }
 0x6c1   :  { %1433 = vpow2.f32 %v683_v16  ;;  %v763_v22 = vsel %vm70_vm0, %v761_v19, 1065369472 }
 0x6c2   :  { %v767_v28 = vsel %vm175_vm1, %v763_v22, 0 }
 0x6ce   :  { %v1434_v20 = vpop.eup %1433 }
 0x6cf   :  { %v685_v23 = vpack.c.bf16 %v1434_v20, %v1434_v20 }
 0x6d1   :  { %1299 = vmatmul.mubr.msk.bf16.vlgmr.msra.gmra.mxu1 %vm161_vm2, %v685_v23 }
 0x6d2   :  { %1303 = vmatpush3.bf16.msra.mxu1 %v767_v28  ;;  %1304 = vmatprep.mubr.msk.bf16.mxu1 %vm1484_vm3, %v1480_v9 }
 0x6d3   :  { %1308 = vmatprep.subr.bf16.mxu1 %v1480_v9 }
 0x6f1   :  { %v754_v39 = vpop.xlane.xlu1 %753 }
 0x6f2   :  { %v755_v29 = vsub.f32 %v751_v6, %v754_v39  ;;  %v1401_v39 = vld [vmem:[%s1802_s6 + $0x38] sm:$0xff]  }
 0x6f3   :  { %1321 = vmatpush3.bf16.msra.mxu0 %v1401_v39 }
 0x6f4   :  { %v756_v30 = vmul.f32 1.442695, %v755_v29  ;;  %1322 = vmatprep.subr.bf16.mxu0 %v1480_v9  ;;  %v1402_v29 = vld [vmem:[%s1802_s6 + $0x30] sm:$0xff]  }
 0x6f5   :  { %v830_v31 = vpop.xlane.xlu1 %829 }
 0x6f6   :  { %1435 = vpow2.f32 %v756_v30  ;;  %v831_v33 = vsub.f32 %v827_v25, %v830_v31  ;;  %v1403_v30 = vld [vmem:[%s1802_s6 + $0x28] sm:$0xff]   ;;  %v1404_v31 = vld [vmem:[%s1802_s6 + $0x20] sm:$0xff]  }
 0x6f7   :  { %1323 = vmatpush3.bf16.msra.mxu0 %v1402_v29 }
 0x6f8   :  { %v832_v2 = vmul.f32 1.442695, %v831_v33  ;;  %1324 = vmatprep.subr.bf16.mxu0 %v1480_v9  ;;  %v1405_v33 = vld [vmem:[%s1802_s6 + $0x18] sm:$0xff]  }
 0x6f9   :  { %v905_v34 = vpop.xlane.xlu1 %904 }
 0x6fa   :  { %1437 = vpow2.f32 %v832_v2  ;;  %v906_v35 = vsub.f32 %v902_v21, %v905_v34  ;;  %v1406_v2 = vld [vmem:[%s1802_s6 + $0x10] sm:$0xff]   ;;  %v1407_v34 = vld [vmem:[%s1802_s6 + $0x8] sm:$0xff]  }
 0x6fb   :  { %1325 = vmatpush3.bf16.msra.mxu0 %v1403_v30 }
 0x6fc   :  { %v907_v37 = vmul.f32 1.442695, %v906_v35  ;;  %1326 = vmatprep.subr.bf16.mxu0 %v1480_v9  ;;  %v1408_v35 = vld [vmem:[%s1802_s6] sm:$0xff]  }
 0x6fd   :  { %v911_v43 = vpop.permute.xlu1 %910 }
 0x6fe   :  { %1439 = vpow2.f32 %v907_v37  ;;  %v913_v45 = vsel %vm70_vm0, %v911_v43, 1065369472 }
 0x6ff   :  { %v917_v47 = vsel %vm175_vm1, %v913_v45, 0  ;;  %1327 = vmatpush3.bf16.msra.mxu0 %v1404_v31 }
 0x700   :  { %1328 = vmatprep.subr.bf16.mxu0 %v1480_v9 }
 0x703   :  { %v1436_v38 = vpop.eup %1435  ;;  %1329 = vmatpush3.bf16.msra.mxu0 %v1405_v33 }
 0x704   :  { %v758_v41 = vpack.c.bf16 %v1436_v38, %v1436_v38  ;;  %1330 = vmatprep.subr.bf16.mxu0 %v1480_v9 }
 0x706   :  { %1305 = vmatmul.mubr.msk.bf16.vlgmr.msra.gmra.mxu1 %vm161_vm2, %v758_v41 }
 0x707   :  { %1309 = vmatpush3.bf16.msra.mxu1 %v842_v42  ;;  %1310 = vmatprep.mubr.msk.bf16.mxu1 %vm1484_vm3, %v1480_v9  ;;  %v1438_v44 = vpop.eup %1437 }
 0x708   :  { %1314 = vmatprep.subr.bf16.mxu1 %v1480_v9  ;;  %v834_v46 = vpack.c.bf16 %v1438_v44, %v1438_v44  ;;  %1331 = vmatpush3.bf16.msra.mxu0 %v1406_v2 }
 0x709   :  { %1332 = vmatprep.subr.bf16.mxu0 %v1480_v9 }
 0x70b   :  { %v1440_v48 = vpop.eup %1439 }
 0x70c   :  { %v909_v49 = vpack.c.bf16 %v1440_v48, %v1440_v48  ;;  %1333 = vmatpush3.bf16.msra.mxu0 %v1407_v34 }
 0x70d   :  { %1334 = vmatprep.subr.bf16.mxu0 %v1480_v9 }
 0x70e   :  { %1311 = vmatmul.mubr.msk.bf16.vlgmr.msra.gmra.mxu1 %vm161_vm2, %v834_v46 }
 0x70f   :  { %1315 = vmatpush3.bf16.msra.mxu1 %v917_v47  ;;  %1316 = vmatprep.mubr.msk.bf16.mxu1 %vm1484_vm3, %v1480_v9 }
 0x710   :  { %1340 = vmatprep.subr.bf16.mxu1 %v1480_v9  ;;  %1335 = vmatpush3.bf16.msra.mxu0 %v1408_v35 }
 0x716   :  { %1317 = vmatmul.mubr.msk.bf16.vlgmr.msra.gmra.mxu1 %vm161_vm2, %v909_v49  ;;  %v1409_v49 = vld [vmem:[%s1804_s8 + $0x8] sm:$0xff]  }
 0x717   :  { %1344 = vmatprep.mubr.msk.bf16.mxu1 %vm1484_vm3, %v1480_v9  ;;  %1341 = vmatpush3.bf16.msra.mxu1 %v1409_v49 }
 0x718   :  { %1342 = vmatprep.subr.bf16.mxu1 %v1480_v9  ;;  %v1128_v9 = vld [vmem:[%s1805_s9] sm:$0x1] }
 0x791   :  { %v727_v50 = vpop.f32.mrf.mxu1 }
 0x793   :  { %v1300_v51 = vpop.f32.mrf.mxu1 }
 0x794   :  { %v1025_v51 = vld [vmem:[%s1803_s7] sm:$0x1]  ;;  %s1455_s7 = scalar_lea.vmem %s1193_s16, 16 }
 0x795   :  { %v730_v52 = vpop.f32.mrf.mxu1  ;;  %p1456_p0 = scmp.ne.s32.totalorder %s1193_s16, %s1455_s7  ;;  %p1461_p2 = scmp.lt.s32.totalorder %s1459_s4, %s1455_s7 }
 0x797   :  { %v1301_v53 = vpop.f32.mrf.mxu1  ;;  %p1462_p3 = por %p1461_p2, %p1460_p1 }
 0x799   :  { %p1463_p4 = pnand %p1462_p3, %p1456_p0 }
 0x7c6   :  { %v803_v54 = vpop.f32.mrf.mxu1 }
 0x7c7   :  { %1441 = vrcp.f32 %v803_v54 }
 0x7c8   :  { %v1306_v55 = vpop.f32.mrf.mxu1 }
 0x7ca   :  { %v806_v56 = vpop.f32.mrf.mxu1 }
 0x7cc   :  { %v1307_v57 = vpop.f32.mrf.mxu1 }
 0x7ce   :  { %v878_v58 = vpop.f32.mrf.mxu1 }
 0x7cf   :  { %1443 = vrcp.f32 %v878_v58 }
 0x7d0   :  { %v1312_v59 = vpop.f32.mrf.mxu1 }
 0x7d2   :  { %v881_v18 = vpop.f32.mrf.mxu1 }
 0x7d4   :  { %v1442_v60 = vpop.eup %1441  ;;  %v1313_v61 = vpop.f32.mrf.mxu1 }
 0x7d5   :  { %812 = vperm.xlu1 %1364, %v1442_v60  }
 0x7d6   :  { %v953_v7 = vpop.f32.mrf.mxu1 }
 0x7d7   :  { %1445 = vrcp.f32 %v953_v7 }
 0x7d8   :  { %v1318_v62 = vpop.f32.mrf.mxu1  ;;  %1447 = vrcp.f32 %v727_v50 }
 0x7da   :  { %v956_v17 = vpop.f32.mrf.mxu1 }
 0x7dc   :  { %v1444_v32 = vpop.eup %1443  ;;  %v1319_v63 = vpop.f32.mrf.mxu1 }
 0x7dd   :  { %887 = vperm.xlu1 %1364, %v1444_v32  }
 0x7e4   :  { %v1446_v8 = vpop.eup %1445 }
 0x7e5   :  { %962 = vperm.xlu1 %1364, %v1446_v8   ;;  %v1448_v24 = vpop.eup %1447 }
 0x7e9   :  { %736 = vperm.xlu1 %1364, %v1448_v24  }
 0x850   :  { %v813_v0 = vpop.permute.xlu1 %812 }
 0x851   :  { %v815_v1 = vmul.f32 %v813_v0, %v803_v54 }
 0x853   :  { %967 = vrot.lane.b32.xlu1 %v815_v1, %s1486_s24 }
 0x858   :  { %v888_v3 = vpop.permute.xlu1 %887 }
 0x859   :  { %v890_v4 = vmul.f32 %v888_v3, %v878_v58 }
 0x85b   :  { %971 = vrot.lane.b32.xlu1 %v890_v4, %s1485_s23 }
 0x860   :  { %v963_v5 = vpop.permute.xlu1 %962 }
 0x861   :  { %v965_v6 = vmul.f32 %v963_v5, %v953_v7 }
 0x863   :  { %975 = vrot.lane.b32.xlu1 %v965_v6, %s1483_s1 }
 0x864   :  { %v737_v10 = vpop.permute.xlu1 %736 }
 0x865   :  { %v739_v25 = vmul.f32 %v737_v10, %v727_v50  ;;  %v1410_v50 = vld [vmem:[%s1804_s8] sm:$0xff]  }
 0x866   :  { %1343 = vmatpush3.bf16.msra.mxu1 %v1410_v50 }
 0x8c5   :  { %v968_v11 = vpop.permute.xlu1 %967 }
 0x8c6   :  { %v978_v13 = vsel %vm70_vm0, %v739_v25, %v968_v11 }
 0x8cd   :  { %v972_v12 = vpop.permute.xlu1 %971 }
 0x8ce   :  { %v979_v21 = vsel %vm464_vm4, %v978_v13, %v972_v12 }
 0x8d5   :  { %v976_v27 = vpop.permute.xlu1 %975 }
 0x8d6   :  { %v980_v14 = vsel %vm466_vm5, %v979_v21, %v976_v27 }
 0x8d7   :  { %v988_v15 = vadd.f32 %v1231_v26, %v980_v14 }
 0x8d9   :  { %v990_v16 = vmin.f32 %v988_v15, 0.0  ;;  %vm989_vm9 = vcmp.gt.f32.partialorder %v988_v15, 0.0 }
 0x8db   :  { %v991_v19 = vmul.f32 1.442695, %v990_v16 }
 0x8dd   :  { %1449 = vpow2.f32 %v991_v19 }
 0x8ea   :  { %v1450_v20 = vpop.eup %1449 }
 0x8eb   :  { %v1232_v22 = vadd.f32 -1.0, %v1450_v20 }
 0x8ed   :  { %v994_v23 = vsel %vm989_vm9, %v988_v15, %v1232_v22 }
 0x8ee   :  { %v995_v28 = vmul.f32 %v994_v23, %v994_v23 }
 0x8f0   :  { %996 = vadd.xlane.f32.xlu1 %v995_v28 }
 0x979   :  { %v997_v36 = vpop.xlane.xlu1 %996 }
 0x97a   :  { %1451 = vrsqrt.f32 %v997_v36  ;;  %vm1000_vm10 = vcmp.eq.f32.partialorder %v997_v36, inf  ;;  %v1003_v40 = vand.u32 2147483648, %v997_v36  ;;  %vm1002_vm11 = vcmp.eq.f32.partialorder %v997_v36, 0.0 }
 0x987   :  { %v1452_v37 = vpop.eup %1451 }
 0x988   :  { %v999_v38 = vmul.f32 %v1452_v37, %v997_v36 }
 0x98a   :  { %v1001_v41 = vsel %vm1000_vm10, %v997_v36, %v999_v38 }
 0x98b   :  { %v1004_v42 = vsel %vm1002_vm11, %v1003_v40, %v1001_v41 }
 0x98c   :  { %v1005_v43 = vmax.f32 %v1004_v42, 1e-12 }
 0x98e   :  { %1453 = vrcp.f32 %v1005_v43 }
 0x99b   :  { %v1454_v44 = vpop.eup %1453 }
 0x99c   :  { %v1007_v45 = vmul.f32 %v1454_v44, %v994_v23 }
 0x99e   :  { %v1008_v46 = vpack.c.bf16 %v1007_v45, %v1007_v45 }
 0x9a0   :  { %v1027_v47 = vshrl.u32 %v1008_v46, 16 }
 0x9a2   :  { %v1029_v48 = vrot.slane %v1027_v47, 3 }
 0x9a4   :  { %1337 = vmatmul.mubr.bf16.vlgmr.msra.gmra.mxu0 %v1029_v48 }
 0xa64   :  { %v1113_v52 = vpop.f32.mrf.mxu0 }
 0xa65   :  { %v1114_v53 = vadd.f32 %v1113_v52, %v1025_v51 }
 0xa66   :  { %v1338_v54 = vpop.f32.mrf.mxu0 }
 0xa67   :  { %v1119_v55 = vmax.f32 %v1114_v53, 0.0 }
 0xa68   :  { %v1116_v56 = vpop.f32.mrf.mxu0 }
 0xa69   :  { %1121 = vst.msk [vmem:[#allocation2] sm:$0x1] %vm1120_vm12, %v1119_v55 }
 0xa6a   :  { %v1339_v57 = vpop.f32.mrf.mxu0 }
 0xa70   :  { %v1122_v58 = vld [vmem:[#allocation2] sm:$0x1] }
 0xa71   :  { %v1123_v59 = vpack.c.bf16 %v1122_v58, %v1122_v58 }
 0xa73   :  { %1345 = vmatmul.mubr.msk.bf16.vlgmr.msra.gmra.mxu1 %vm70_vm0, %v1123_v59 }
 0xb33   :  { %v1179_v18 = vpop.f32.mrf.mxu1 }
 0xb34   :  { %v1180_v60 = vadd.f32 %v1179_v18, %v1128_v9 }
 0xb35   :  { %v1346_v61 = vpop.f32.mrf.mxu1 }
 0xb36   :  { %1185 = vst [vmem:[#allocation3] sm:$0x1] %v1180_v60 }
 0xb37   :  { %v1182_v7 = vpop.f32.mrf.mxu1 }
 0xb38   :  { %1466 = shalt.err (!%p1463_p4)
}
 0xb39   :  { %1195 = dma.vmem_to_hbm [thread:$0]  %s1193_s16, 16, %s1806_s10, [#allocation4]   ;;  %v1347_v62 = vpop.f32.mrf.mxu1 }
 0xb3a   :  { %1475 = dma.done.wait [#allocation4], 16  }
 0xb3b   :  { %1476 = vsyncadd [#allocation4], 4294967280 }
 0xb3c   :  { %1199 = vsyncpa [#allocation4], 1 }

</bundles_post_ra>
